<compile_context>
chip_gen: v7x
topology: tpu7x:2x2x1
jax: 0.10.0
libtpu: 0.0.40
codegen_flags: <defaults>
</compile_context>

<pallas_src>
import jax
import jax.numpy as jnp
from jax import lax
from jax.experimental import pallas as pl
from jax.experimental.pallas import tpu as pltpu


def _round_up(x, m):
    return (x + m - 1) // m * m


def _pick_row_tile(Bp, itemsize):
    """Rows per grid step: single tile for small matrices, else ~1 MiB row
    slabs (a multiple of 128 that evenly divides the padded batch)."""
    if Bp <= 512:
        return Bp
    tm = ((1 << 20) // (Bp * itemsize)) // 128 * 128
    tm = max(128, min(Bp, tm))
    if Bp % tm != 0:
        tm = 128  # 128 always divides Bp (Bp is a multiple of 128)
    return tm


def _make_kernel(B, Bp, tm, margin, margin_pos, threshold_pos,
                 max_violation, direction, average_batch):
    margin = float(margin)
    margin_pos = float(margin_pos)
    thr = float(threshold_pos)
    need_i2t = direction in ("i2t", "bi")
    need_t2i = direction in ("t2i", "bi")
    # topk==1 branches (max_violation loss + both hp losses): /topk(=1) then /B
    div_topk = float(B) if average_batch else 1.0
    # max_violation=False loss branch: /(B*(B-1))
    div_sum = float(B * (B - 1)) if average_batch else 1.0
    neg_inf = float("-inf")

    def relu(x):
        return jnp.maximum(x, 0.0)

    def kernel(diag_ref, s_ref, rel_ref, out_ref, colmax_ref, colmin_ref):
        pid = pl.program_id(0)
        last = pl.num_programs(0) - 1

        @pl.when(pid == 0)
        def _init():
            out_ref[...] = jnp.zeros_like(out_ref)
            if need_t2i:
                colmax_ref[...] = jnp.full(colmax_ref.shape, neg_inf, colmax_ref.dtype)
                colmin_ref[...] = jnp.full(colmin_ref.shape, float("inf"), colmin_ref.dtype)

        s = s_ref[...].astype(jnp.float32)          # (tm, Bp)
        rel = rel_ref[...].astype(jnp.float32)      # (tm, Bp)

        grow = lax.broadcasted_iota(jnp.int32, (tm, Bp), 0) + pid * tm   # global row
        gcol = lax.broadcasted_iota(jnp.int32, (tm, Bp), 1)              # global col
        valid = (grow < B) & (gcol < B)             # excludes padded rows/cols
        diag_mask = (grow == gcol) & (grow < B)     # true diagonal only
        pos_rel = (rel >= thr) & valid              # batch_relevance >= threshold_pos
        zero_mask = diag_mask | pos_rel | (~valid)  # entries forced to 0 in the costs
        one_mask = (~pos_rel) | diag_mask           # entries forced to 1 in hp_scores

        s_neg = jnp.where(zero_mask, neg_inf, s)    # only "negative" pairs survive
        hp_scores = jnp.where(one_mask, 1.0, s)     # shared by both directions

        # ---------- i2t (negative sentences; reductions along dim=1) ----------
        if need_i2t:
            rowmax = jnp.max(s_neg, axis=1, keepdims=True)                  # (tm, 1)
            hp_min = jnp.min(hp_scores, axis=1, keepdims=True)              # (tm, 1)
            diag_row = jnp.max(jnp.where(diag_mask, s, neg_inf),
                               axis=1, keepdims=True)                       # (tm, 1)
            row_ok = (lax.broadcasted_iota(jnp.int32, (tm, 1), 0) + pid * tm) < B

            if max_violation:
                c = jnp.where(row_ok, relu(margin - diag_row + rowmax), 0.0)
                out_ref[:, 0:1] += jnp.sum(c, axis=0, keepdims=True) / div_topk
            else:
                cost_s = jnp.where(zero_mask, 0.0, relu(margin + s - diag_row))
                part = jnp.sum(jnp.sum(cost_s, axis=1, keepdims=True),
                               axis=0, keepdims=True)
                out_ref[:, 0:1] += part / div_sum

            hc = jnp.where(row_ok, relu(margin_pos - hp_min + rowmax), 0.0)
            out_ref[:, 1:2] += jnp.sum(hc, axis=0, keepdims=True) / div_topk

        # ---------- t2i (negative images; reductions along dim=0) -------------
        if need_t2i:
            colmax_ref[...] = jnp.maximum(colmax_ref[...],
                                          jnp.max(s_neg, axis=0, keepdims=True))
            colmin_ref[...] = jnp.minimum(colmin_ref[...],
                                          jnp.min(hp_scores, axis=0, keepdims=True))
            if not max_violation:
                d_col = diag_ref[...].astype(jnp.float32)                   # (1, Bp)
                cost_im = jnp.where(zero_mask, 0.0, relu(margin + s - d_col))
                part = jnp.sum(jnp.sum(cost_im, axis=1, keepdims=True),
                               axis=0, keepdims=True)
                out_ref[:, 0:1] += part / div_sum

            @pl.when(pid == last)
            def _finalize():
                d_col = diag_ref[...].astype(jnp.float32)                   # (1, Bp)
                col_ok = lax.broadcasted_iota(jnp.int32, (1, Bp), 1) < B
                colmax = colmax_ref[...]
                if max_violation:
                    c_im = jnp.where(col_ok, relu(margin - d_col + colmax), 0.0)
                    out_ref[:, 0:1] += jnp.sum(c_im, axis=1, keepdims=True) / div_topk
                hc_im = jnp.where(col_ok,
                                  relu(margin_pos - colmin_ref[...] + colmax), 0.0)
                out_ref[:, 1:2] += jnp.sum(hc_im, axis=1, keepdims=True) / div_topk

    return kernel


def contrastive_loss_hp(scores, batch_relevance, *, margin=0.0, margin_pos=0.0,
                        max_violation=False, direction="bi", topk=1,
                        average_batch=True, threshold_pos=1.0, row_tile=None):
    """Pallas implementation of ContrastiveLossHP.forward.  Returns (loss, hp_loss)."""
    assert scores.ndim == 2 and scores.shape[0] == scores.shape[1]
    assert batch_relevance.shape == scores.shape
    assert direction in ("i2t", "t2i", "bi")
    B = scores.shape[0]
    # TODO(synk): topk > 1 (torch.topk partial sort along a row/column) has no
    # clean single-pass Pallas equivalent; only batch_topk == 1 is supported.
    assert min(B, topk) == 1, "only topk == 1 is supported"

    Bp = _round_up(B, 128)                              # lane-align the matrix
    diag = jnp.diagonal(scores).astype(jnp.float32)     # tiny; t2i tiles need it
    if Bp != B:
        pad = Bp - B
        scores = jnp.pad(scores, ((0, pad), (0, pad)))
        batch_relevance = jnp.pad(batch_relevance, ((0, pad), (0, pad)))
        diag = jnp.pad(diag, (0, pad))
    diag = diag.reshape(1, Bp)

    itemsize = jnp.dtype(scores.dtype).itemsize
    if row_tile is None:
        tm = _pick_row_tile(Bp, itemsize)
    else:
        tm = int(row_tile)
        assert tm % 8 == 0 and Bp % tm == 0, (tm, Bp)
    ntiles = Bp // tm

    kernel = _make_kernel(B, Bp, tm, margin, margin_pos, threshold_pos,
                          max_violation, direction, average_batch)

    ndir = 2 if direction == "bi" else 1
    cost = pl.CostEstimate(
        flops=12 * ndir * B * B,
        transcendentals=0,
        bytes_accessed=2 * B * B * itemsize + Bp * 4 + 8,
    )

    out = pl.pallas_call(
        kernel,
        out_shape=jax.ShapeDtypeStruct((1, 2), jnp.float32),
        grid_spec=pltpu.PrefetchScalarGridSpec(
            num_scalar_prefetch=0,
            grid=(ntiles,),
            in_specs=[
                pl.BlockSpec((1, Bp), lambda i: (0, 0)),    # diagonal (broadcast)
                pl.BlockSpec((tm, Bp), lambda i: (i, 0)),   # scores row tile
                pl.BlockSpec((tm, Bp), lambda i: (i, 0)),   # relevance row tile
            ],
            out_specs=pl.BlockSpec((1, 2), lambda i: (0, 0)),   # [loss, hp_loss]
            scratch_shapes=[
                pltpu.VMEM((1, Bp), jnp.float32),   # running col-max of masked scores
                pltpu.VMEM((1, Bp), jnp.float32),   # running col-min of hp_scores
            ],
        ),
        compiler_params=pltpu.CompilerParams(
            dimension_semantics=("arbitrary",),     # cross-tile column accumulators
            vmem_limit_bytes=32 * 1024 * 1024,
        ),
        cost_estimate=cost,
    )(diag, scores, batch_relevance)
    return out[0, 0], out[0, 1]


# ---------------- pure-JAX reference (mirrors the PyTorch code) ----------------
def _reference(scores, rel, *, margin, margin_pos, max_violation, direction,
               average_batch, threshold_pos):
    B = scores.shape[0]
    s = scores.astype(jnp.float32)
    r = rel.astype(jnp.float32)
    eye = jnp.eye(B, dtype=bool)
    pos = r >= threshold_pos
    diag = jnp.diag(s).reshape(B, 1)

    loss = jnp.float32(0.0)
    hp_loss = jnp.float32(0.0)

    if direction in ("i2t", "bi"):
        cost_s = jnp.maximum(margin + s - diag, 0.0)
        cost_s = jnp.where(eye | pos, 0.0, cost_s)
        if max_violation:
            loss += jnp.sum(jnp.max(cost_s, axis=1)) / (B if average_batch else 1)
        else:
            loss += jnp.sum(cost_s) / ((B * (B - 1)) if average_batch else 1)
        hp = jnp.where((~pos) | eye, 1.0, s)
        hp_min = jnp.min(hp, axis=1, keepdims=True)
        hc = jnp.maximum(margin_pos + s - hp_min, 0.0)
        hc = jnp.where(eye | pos, 0.0, hc)
        hp_loss += jnp.sum(jnp.max(hc, axis=1)) / (B if average_batch else 1)

    if direction in ("t2i", "bi"):
        cost_im = jnp.maximum(margin + s - diag.T, 0.0)
        cost_im = jnp.where(eye | pos, 0.0, cost_im)
        if max_violation:
            loss += jnp.sum(jnp.max(cost_im, axis=0)) / (B if average_batch else 1)
        else:
            loss += jnp.sum(cost_im) / ((B * (B - 1)) if average_batch else 1)
        hp = jnp.where((~pos) | eye, 1.0, s)
        hp_min = jnp.min(hp, axis=0, keepdims=True)
        hc = jnp.maximum(margin_pos + s - hp_min, 0.0)
        hc = jnp.where(eye | pos, 0.0, hc)
        hp_loss += jnp.sum(jnp.max(hc, axis=0)) / (B if average_batch else 1)

    return loss, hp_loss


if __name__ == "__main__":
    def _check(B, cfg, row_tile=None, dtype=jnp.float32):
        k1, k2 = jax.random.split(jax.random.PRNGKey(0))
        scores = (jax.random.normal(k1, (B, B), dtype=jnp.float32) * 0.5).astype(dtype)
        # relevance in [0, 1.3) so some entries exceed threshold_pos = 1.0
        rel = (jax.random.uniform(k2, (B, B), dtype=jnp.float32) * 1.3).astype(dtype)
        loss, hp = contrastive_loss_hp(scores, rel, average_batch=True,
                                       threshold_pos=1.0, topk=1,
                                       row_tile=row_tile, **cfg)
        loss = jax.block_until_ready(loss)
        hp = jax.block_until_ready(hp)
        ref_l, ref_h = _reference(scores, rel, average_batch=True,
                                  threshold_pos=1.0, **cfg)
        assert jnp.allclose(loss, ref_l, atol=1e-5, rtol=1e-5), (B, cfg, loss, ref_l)
        assert jnp.allclose(hp, ref_h, atol=1e-5, rtol=1e-5), (B, cfg, hp, ref_h)

    configs = [
        dict(margin=0.2, margin_pos=0.1, max_violation=False, direction="bi"),
        dict(margin=0.2, margin_pos=0.1, max_violation=True, direction="bi"),
        dict(margin=0.2, margin_pos=0.1, max_violation=True, direction="i2t"),
        dict(margin=0.2, margin_pos=0.1, max_violation=False, direction="t2i"),
    ]

    for cfg in configs:
        _check(8, cfg)                       # tiny batch, padded to 128, single tile
    _check(8, configs[0], row_tile=32)       # exercise multi-tile column accumulators
    _check(8, configs[1], row_tile=32)
    _check(8, configs[1], dtype=jnp.bfloat16)   # native bf16 inputs, f32 in-kernel math

    print("KERNEL_OK")
</pallas_src>

<mosaic_0001>
module attributes {stable_mosaic.version = 11 : i64} {
  func.func @kernel(%arg0: i32, %arg1: memref<1x128xf32, #tpu.memory_space<vmem>>, %arg2: memref<128x128xf32, #tpu.memory_space<vmem>>, %arg3: memref<128x128xf32, #tpu.memory_space<vmem>>, %arg4: memref<1x2xf32, #tpu.memory_space<vmem>>, %arg5: memref<1x128xf32, #tpu.memory_space<vmem>>, %arg6: memref<1x128xf32, #tpu.memory_space<vmem>>) attributes {dimension_semantics = [#tpu.dimension_semantics<arbitrary>], iteration_bounds = array<i64: 1>, scalar_prefetch = 0 : i64, scratch_operands = 2 : i64, tpu.core_type = #tpu.core_type<tc>, window_params = [{pipeline_mode = #tpu.pipeline_mode<synchronous>, transform_indices = @transform_0, window_bounds = array<i64: 1, 128>}, {transform_indices = @transform_1, window_bounds = array<i64: 128, 128>}, {transform_indices = @transform_2, window_bounds = array<i64: 128, 128>}, {pipeline_mode = #tpu.pipeline_mode<synchronous>, transform_indices = @transform_3, window_bounds = array<i64: 1, 2>}]} {
    %c0_i32 = arith.constant 0 : i32
    %0 = arith.cmpi eq, %arg0, %c0_i32 : i32
    %1 = arith.extui %0 : i1 to i32
    %c0_i32_0 = arith.constant 0 : i32
    %2 = arith.cmpi ne, %1, %c0_i32_0 : i32
    scf.if %2 {
      %cst_58 = arith.constant 0.000000e+00 : f32
      %107 = vector.broadcast %cst_58 : f32 to vector<1x2xf32>
      %c0_59 = arith.constant 0 : index
      %c0_60 = arith.constant 0 : index
      %108 = vector.load %arg4[%c0_59, %c0_60] : memref<1x2xf32, #tpu.memory_space<vmem>>, vector<1x2xf32>
      tpu.vector_store %arg4[%c0_59, %c0_60], %107 {strides = array<i32>} : memref<1x2xf32, #tpu.memory_space<vmem>>, vector<1x2xf32>,
      %cst_61 = arith.constant 0xFF800000 : f32
      %109 = vector.broadcast %cst_61 : f32 to vector<1x128xf32>
      %c0_62 = arith.constant 0 : index
      %c0_63 = arith.constant 0 : index
      %110 = vector.load %arg5[%c0_62, %c0_63] : memref<1x128xf32, #tpu.memory_space<vmem>>, vector<1x128xf32>
      tpu.vector_store %arg5[%c0_62, %c0_63], %109 {strides = array<i32>} : memref<1x128xf32, #tpu.memory_space<vmem>>, vector<1x128xf32>,
      %cst_64 = arith.constant 0x7F800000 : f32
      %111 = vector.broadcast %cst_64 : f32 to vector<1x128xf32>
      %c0_65 = arith.constant 0 : index
      %c0_66 = arith.constant 0 : index
      %112 = vector.load %arg6[%c0_65, %c0_66] : memref<1x128xf32, #tpu.memory_space<vmem>>, vector<1x128xf32>
      tpu.vector_store %arg6[%c0_65, %c0_66], %111 {strides = array<i32>} : memref<1x128xf32, #tpu.memory_space<vmem>>, vector<1x128xf32>,
    } else {
    }
    %c0 = arith.constant 0 : index
    %c0_1 = arith.constant 0 : index
    %3 = vector.load %arg2[%c0, %c0_1] : memref<128x128xf32, #tpu.memory_space<vmem>>, vector<128x128xf32>
    %c0_2 = arith.constant 0 : index
    %c0_3 = arith.constant 0 : index
    %4 = vector.load %arg3[%c0_2, %c0_3] : memref<128x128xf32, #tpu.memory_space<vmem>>, vector<128x128xf32>
    %5 = tpu.iota {dimensions = array<i32: 0>} : vector<128x128xi32>
    %c128_i32 = arith.constant 128 : i32
    %6 = arith.muli %arg0, %c128_i32 : i32
    %7 = vector.broadcast %6 : i32 to vector<128x128xi32>
    %8 = arith.addi %5, %7 : vector<128x128xi32>
    %9 = tpu.iota {dimensions = array<i32: 1>} : vector<128x128xi32>
    %c8_i32 = arith.constant 8 : i32
    %10 = vector.broadcast %c8_i32 : i32 to vector<128x128xi32>
    %11 = arith.cmpi slt, %8, %10 : vector<128x128xi32>
    %c8_i32_4 = arith.constant 8 : i32
    %12 = vector.broadcast %c8_i32_4 : i32 to vector<128x128xi32>
    %13 = arith.cmpi slt, %9, %12 : vector<128x128xi32>
    %14 = arith.andi %11, %13 : vector<128x128xi1>
    %15 = arith.cmpi eq, %8, %9 : vector<128x128xi32>
    %c8_i32_5 = arith.constant 8 : i32
    %16 = vector.broadcast %c8_i32_5 : i32 to vector<128x128xi32>
    %17 = arith.cmpi slt, %8, %16 : vector<128x128xi32>
    %18 = arith.andi %15, %17 : vector<128x128xi1>
    %cst = arith.constant 1.000000e+00 : f32
    %19 = vector.broadcast %cst : f32 to vector<128x128xf32>
    %20 = arith.cmpf oge, %4, %19 : vector<128x128xf32>
    %21 = arith.andi %20, %14 : vector<128x128xi1>
    %22 = arith.ori %18, %21 : vector<128x128xi1>
    %cst_6 = arith.constant dense<true> : vector<128x128xi1>
    %23 = arith.xori %14, %cst_6 : vector<128x128xi1>
    %24 = arith.ori %22, %23 : vector<128x128xi1>
    %cst_7 = arith.constant dense<true> : vector<128x128xi1>
    %25 = arith.xori %21, %cst_7 : vector<128x128xi1>
    %26 = arith.ori %25, %18 : vector<128x128xi1>
    %cst_8 = arith.constant 0xFF800000 : f32
    %27 = vector.broadcast %cst_8 : f32 to vector<128x128xf32>
    %28 = arith.select %24, %27, %3 : vector<128x128xi1>, vector<128x128xf32>
    %cst_9 = arith.constant 1.000000e+00 : f32
    %29 = vector.broadcast %cst_9 : f32 to vector<128x128xf32>
    %30 = arith.select %26, %29, %3 : vector<128x128xi1>, vector<128x128xf32>
    %cst_10 = arith.constant dense<0xFF800000> : vector<128xf32>
    %31 = vector.multi_reduction <maximumf>, %28, %cst_10 [1] : vector<128x128xf32> to vector<128xf32>
    %32 = vector.shape_cast %31 : vector<128xf32> to vector<128x1xf32>
    %cst_11 = arith.constant dense<0x7F800000> : vector<128xf32>
    %33 = vector.multi_reduction <minimumf>, %30, %cst_11 [1] : vector<128x128xf32> to vector<128xf32>
    %34 = vector.shape_cast %33 : vector<128xf32> to vector<128x1xf32>
    %cst_12 = arith.constant 0xFF800000 : f32
    %35 = vector.broadcast %cst_12 : f32 to vector<128x128xf32>
    %36 = arith.select %18, %3, %35 : vector<128x128xi1>, vector<128x128xf32>
    %cst_13 = arith.constant dense<0xFF800000> : vector<128xf32>
    %37 = vector.multi_reduction <maximumf>, %36, %cst_13 [1] : vector<128x128xf32> to vector<128xf32>
    %38 = vector.shape_cast %37 : vector<128xf32> to vector<128x1xf32>
    %39 = tpu.iota {dimensions = array<i32: 0>} : vector<128x1xi32>
    %c128_i32_14 = arith.constant 128 : i32
    %40 = arith.muli %arg0, %c128_i32_14 : i32
    %41 = vector.broadcast %40 : i32 to vector<128x1xi32>
    %42 = arith.addi %39, %41 : vector<128x1xi32>
    %c8_i32_15 = arith.constant 8 : i32
    %43 = vector.broadcast %c8_i32_15 : i32 to vector<128x1xi32>
    %44 = arith.cmpi slt, %42, %43 : vector<128x1xi32>
    %cst_16 = arith.constant 2.000000e-01 : f32
    %45 = vector.broadcast %cst_16 : f32 to vector<128x128xf32>
    %46 = arith.addf %45, %3 : vector<128x128xf32>
    %47 = vector.broadcast %38 : vector<128x1xf32> to vector<128x128xf32>
    %48 = arith.subf %46, %47 : vector<128x128xf32>
    %cst_17 = arith.constant 0.000000e+00 : f32
    %49 = vector.broadcast %cst_17 : f32 to vector<128x128xf32>
    %50 = arith.maximumf %48, %49 : vector<128x128xf32>
    %cst_18 = arith.constant 0.000000e+00 : f32
    %51 = vector.broadcast %cst_18 : f32 to vector<128x128xf32>
    %52 = arith.select %24, %51, %50 : vector<128x128xi1>, vector<128x128xf32>
    %cst_19 = arith.constant dense<0.000000e+00> : vector<128xf32>
    %53 = vector.multi_reduction <add>, %52, %cst_19 [1] : vector<128x128xf32> to vector<128xf32>
    %54 = vector.shape_cast %53 : vector<128xf32> to vector<128x1xf32>
    %cst_20 = arith.constant dense<0.000000e+00> : vector<1xf32>
    %55 = vector.multi_reduction <add>, %54, %cst_20 [0] : vector<128x1xf32> to vector<1xf32>
    %56 = vector.shape_cast %55 : vector<1xf32> to vector<1x1xf32>
    %c0_21 = arith.constant 0 : index
    %c0_22 = arith.constant 0 : index
    %57 = vector.load %arg4[%c0_21, %c0_22] : memref<1x2xf32, #tpu.memory_space<vmem>>, vector<1x1xf32>
    %cst_23 = arith.constant 5.600000e+01 : f32
    %58 = vector.broadcast %cst_23 : f32 to vector<1x1xf32>
    %59 = arith.divf %56, %58 : vector<1x1xf32>
    %60 = arith.addf %57, %59 : vector<1x1xf32>
    %c0_24 = arith.constant 0 : index
    %c0_25 = arith.constant 0 : index
    %61 = vector.load %arg4[%c0_24, %c0_25] : memref<1x2xf32, #tpu.memory_space<vmem>>, vector<1x1xf32>
    tpu.vector_store %arg4[%c0_24, %c0_25], %60 {strides = array<i32>} : memref<1x2xf32, #tpu.memory_space<vmem>>, vector<1x1xf32>,
    %cst_26 = arith.constant 1.000000e-01 : f32
    %62 = vector.broadcast %cst_26 : f32 to vector<128x1xf32>
    %63 = arith.subf %62, %34 : vector<128x1xf32>
    %64 = arith.addf %63, %32 : vector<128x1xf32>
    %cst_27 = arith.constant 0.000000e+00 : f32
    %65 = vector.broadcast %cst_27 : f32 to vector<128x1xf32>
    %66 = arith.maximumf %64, %65 : vector<128x1xf32>
    %cst_28 = arith.constant 0.000000e+00 : f32
    %67 = vector.broadcast %cst_28 : f32 to vector<128x1xf32>
    %68 = arith.select %44, %66, %67 : vector<128x1xi1>, vector<128x1xf32>
    %c0_29 = arith.constant 0 : index
    %c1 = arith.constant 1 : index
    %69 = vector.load %arg4[%c0_29, %c1] : memref<1x2xf32, #tpu.memory_space<vmem>>, vector<1x1xf32>
    %cst_30 = arith.constant dense<0.000000e+00> : vector<1xf32>
    %70 = vector.multi_reduction <add>, %68, %cst_30 [0] : vector<128x1xf32> to vector<1xf32>
    %71 = vector.shape_cast %70 : vector<1xf32> to vector<1x1xf32>
    %cst_31 = arith.constant 8.000000e+00 : f32
    %72 = vector.broadcast %cst_31 : f32 to vector<1x1xf32>
    %73 = arith.divf %71, %72 : vector<1x1xf32>
    %74 = arith.addf %69, %73 : vector<1x1xf32>
    %c0_32 = arith.constant 0 : index
    %c1_33 = arith.constant 1 : index
    %75 = vector.load %arg4[%c0_32, %c1_33] : memref<1x2xf32, #tpu.memory_space<vmem>>, vector<1x1xf32>
    tpu.vector_store %arg4[%c0_32, %c1_33], %74 {strides = array<i32>} : memref<1x2xf32, #tpu.memory_space<vmem>>, vector<1x1xf32>,
    %c0_34 = arith.constant 0 : index
    %c0_35 = arith.constant 0 : index
    %76 = vector.load %arg5[%c0_34, %c0_35] : memref<1x128xf32, #tpu.memory_space<vmem>>, vector<1x128xf32>
    %cst_36 = arith.constant dense<0xFF800000> : vector<128xf32>
    %77 = vector.multi_reduction <maximumf>, %28, %cst_36 [0] : vector<128x128xf32> to vector<128xf32>
    %78 = vector.shape_cast %77 : vector<128xf32> to vector<1x128xf32>
    %79 = arith.maximumf %76, %78 : vector<1x128xf32>
    %c0_37 = arith.constant 0 : index
    %c0_38 = arith.constant 0 : index
    %80 = vector.load %arg5[%c0_37, %c0_38] : memref<1x128xf32, #tpu.memory_space<vmem>>, vector<1x128xf32>
    tpu.vector_store %arg5[%c0_37, %c0_38], %79 {strides = array<i32>} : memref<1x128xf32, #tpu.memory_space<vmem>>, vector<1x128xf32>,
    %c0_39 = arith.constant 0 : index
    %c0_40 = arith.constant 0 : index
    %81 = vector.load %arg6[%c0_39, %c0_40] : memref<1x128xf32, #tpu.memory_space<vmem>>, vector<1x128xf32>
    %cst_41 = arith.constant dense<0x7F800000> : vector<128xf32>
    %82 = vector.multi_reduction <minimumf>, %30, %cst_41 [0] : vector<128x128xf32> to vector<128xf32>
    %83 = vector.shape_cast %82 : vector<128xf32> to vector<1x128xf32>
    %84 = arith.minimumf %81, %83 : vector<1x128xf32>
    %c0_42 = arith.constant 0 : index
    %c0_43 = arith.constant 0 : index
    %85 = vector.load %arg6[%c0_42, %c0_43] : memref<1x128xf32, #tpu.memory_space<vmem>>, vector<1x128xf32>
    tpu.vector_store %arg6[%c0_42, %c0_43], %84 {strides = array<i32>} : memref<1x128xf32, #tpu.memory_space<vmem>>, vector<1x128xf32>,
    %c0_44 = arith.constant 0 : index
    %c0_45 = arith.constant 0 : index
    %86 = vector.load %arg1[%c0_44, %c0_45] : memref<1x128xf32, #tpu.memory_space<vmem>>, vector<1x128xf32>
    %cst_46 = arith.constant 2.000000e-01 : f32
    %87 = vector.broadcast %cst_46 : f32 to vector<128x128xf32>
    %88 = arith.addf %87, %3 : vector<128x128xf32>
    %89 = vector.broadcast %86 : vector<1x128xf32> to vector<128x128xf32>
    %90 = arith.subf %88, %89 : vector<128x128xf32>
    %cst_47 = arith.constant 0.000000e+00 : f32
    %91 = vector.broadcast %cst_47 : f32 to vector<128x128xf32>
    %92 = arith.maximumf %90, %91 : vector<128x128xf32>
    %cst_48 = arith.constant 0.000000e+00 : f32
    %93 = vector.broadcast %cst_48 : f32 to vector<128x128xf32>
    %94 = arith.select %24, %93, %92 : vector<128x128xi1>, vector<128x128xf32>
    %cst_49 = arith.constant dense<0.000000e+00> : vector<128xf32>
    %95 = vector.multi_reduction <add>, %94, %cst_49 [1] : vector<128x128xf32> to vector<128xf32>
    %96 = vector.shape_cast %95 : vector<128xf32> to vector<128x1xf32>
    %cst_50 = arith.constant dense<0.000000e+00> : vector<1xf32>
    %97 = vector.multi_reduction <add>, %96, %cst_50 [0] : vector<128x1xf32> to vector<1xf32>
    %98 = vector.shape_cast %97 : vector<1xf32> to vector<1x1xf32>
    %c0_51 = arith.constant 0 : index
    %c0_52 = arith.constant 0 : index
    %99 = vector.load %arg4[%c0_51, %c0_52] : memref<1x2xf32, #tpu.memory_space<vmem>>, vector<1x1xf32>
    %cst_53 = arith.constant 5.600000e+01 : f32
    %100 = vector.broadcast %cst_53 : f32 to vector<1x1xf32>
    %101 = arith.divf %98, %100 : vector<1x1xf32>
    %102 = arith.addf %99, %101 : vector<1x1xf32>
    %c0_54 = arith.constant 0 : index
    %c0_55 = arith.constant 0 : index
    %103 = vector.load %arg4[%c0_54, %c0_55] : memref<1x2xf32, #tpu.memory_space<vmem>>, vector<1x1xf32>
    tpu.vector_store %arg4[%c0_54, %c0_55], %102 {strides = array<i32>} : memref<1x2xf32, #tpu.memory_space<vmem>>, vector<1x1xf32>,
    %c0_i32_56 = arith.constant 0 : i32
    %104 = arith.cmpi eq, %arg0, %c0_i32_56 : i32
    %105 = arith.extui %104 : i1 to i32
    %c0_i32_57 = arith.constant 0 : i32
    %106 = arith.cmpi ne, %105, %c0_i32_57 : i32
    scf.if %106 {
      %107 = tpu.iota {dimensions = array<i32: 1>} : vector<1x128xi32>
      %c8_i32_58 = arith.constant 8 : i32
      %108 = vector.broadcast %c8_i32_58 : i32 to vector<1x128xi32>
      %109 = arith.cmpi slt, %107, %108 : vector<1x128xi32>
      %c0_59 = arith.constant 0 : index
      %c0_60 = arith.constant 0 : index
      %110 = vector.load %arg5[%c0_59, %c0_60] : memref<1x128xf32, #tpu.memory_space<vmem>>, vector<1x128xf32>
      %c0_61 = arith.constant 0 : index
      %c0_62 = arith.constant 0 : index
      %111 = vector.load %arg6[%c0_61, %c0_62] : memref<1x128xf32, #tpu.memory_space<vmem>>, vector<1x128xf32>
      %cst_63 = arith.constant 1.000000e-01 : f32
      %112 = vector.broadcast %cst_63 : f32 to vector<1x128xf32>
      %113 = arith.subf %112, %111 : vector<1x128xf32>
      %114 = arith.addf %113, %110 : vector<1x128xf32>
      %cst_64 = arith.constant 0.000000e+00 : f32
      %115 = vector.broadcast %cst_64 : f32 to vector<1x128xf32>
      %116 = arith.maximumf %114, %115 : vector<1x128xf32>
      %cst_65 = arith.constant 0.000000e+00 : f32
      %117 = vector.broadcast %cst_65 : f32 to vector<1x128xf32>
      %118 = arith.select %109, %116, %117 : vector<1x128xi1>, vector<1x128xf32>
      %c0_66 = arith.constant 0 : index
      %c1_67 = arith.constant 1 : index
      %119 = vector.load %arg4[%c0_66, %c1_67] : memref<1x2xf32, #tpu.memory_space<vmem>>, vector<1x1xf32>
      %cst_68 = arith.constant dense<0.000000e+00> : vector<1xf32>
      %120 = vector.multi_reduction <add>, %118, %cst_68 [1] : vector<1x128xf32> to vector<1xf32>
      %121 = vector.shape_cast %120 : vector<1xf32> to vector<1x1xf32>
      %cst_69 = arith.constant 8.000000e+00 : f32
      %122 = vector.broadcast %cst_69 : f32 to vector<1x1xf32>
      %123 = arith.divf %121, %122 : vector<1x1xf32>
      %124 = arith.addf %119, %123 : vector<1x1xf32>
      %c0_70 = arith.constant 0 : index
      %c1_71 = arith.constant 1 : index
      %125 = vector.load %arg4[%c0_70, %c1_71] : memref<1x2xf32, #tpu.memory_space<vmem>>, vector<1x1xf32>
      tpu.vector_store %arg4[%c0_70, %c1_71], %124 {strides = array<i32>} : memref<1x2xf32, #tpu.memory_space<vmem>>, vector<1x1xf32>,
    } else {
    }
    return
  }
  func.func @transform_0(%arg0: i32) -> (i32, i32) {
    %c0_i32 = arith.constant 0 : i32
    %c0_i32_0 = arith.constant 0 : i32
    %c0_i32_1 = arith.constant 0 : i32
    return %c0_i32, %c0_i32_0 : i32, i32
  }
  func.func @transform_1(%arg0: i32) -> (i32, i32) {
    %c0_i32 = arith.constant 0 : i32
    %c0_i32_0 = arith.constant 0 : i32
    return %arg0, %c0_i32 : i32, i32
  }
  func.func @transform_2(%arg0: i32) -> (i32, i32) {
    %c0_i32 = arith.constant 0 : i32
    %c0_i32_0 = arith.constant 0 : i32
    return %arg0, %c0_i32 : i32, i32
  }
  func.func @transform_3(%arg0: i32) -> (i32, i32) {
    %c0_i32 = arith.constant 0 : i32
    %c0_i32_0 = arith.constant 0 : i32
    %c0_i32_1 = arith.constant 0 : i32
    return %c0_i32, %c0_i32_0 : i32, i32
  }
}

</mosaic_0001>

<bundles_post_ra>
// kernel: tpu_custom_call.1
= control target key start
LH: loop header
LB: loop body
LE: loop exit
PB: predicated region body
PF: predicated region fallthrough
CT: control target
= control target key end

     0   :  { %8 = vsyncpa [#allocation5], 0  ;;  %s1113_s0 = inlined_call_operand.hbm [shape: f32[1,128], index: 0, kind: input, shape index: {}]   ;;  %s1114_s1 = inlined_call_operand.hbm [shape: f32[128,128], index: 1, kind: input, shape index: {}]   ;;  %s1115_s2 = inlined_call_operand.hbm [shape: f32[128,128], index: 2, kind: input, shape index: {}]   ;;  %s1116_s3 = inlined_call_operand.hbm [shape: f32[1,2], index: 3, kind: output, shape index: {}]  }
   0x1   :  { %9 = vsyncpa [#allocation8], 0 }
   0x2   :  { %10 = vsyncpa [#allocation6], 0  ;;  %s964_s12 = smov [#allocation7]   ;;  %s870_s16 = scalar_lea.hbm %s1114_s1, 2048 }
   0x3   :  { %s26_s13 = sshll.u32 %s964_s12, 4  ;;  %p871_p0 = scmp.ne.s32.totalorder %s1114_s1, %s870_s16  ;;  %s27_s13 = int_to_ptr.vmem [resolvable:$true] %s26_s13 }
   0x4   :  { %p874_p1 = scmp.lt.u32.totalorder %s870_s16, %s1114_s1 }
   0x6   :  { %p876_p2 = pnand %p874_p1, %p871_p0 }
   0x8   :  { %879 = shalt.err (!%p876_p2)
}
   0x9   :  { %s880_s21 = scalar_lea.vmem %s27_s13, 2048  ;;  %p885_p4 = scmp.lt.s32.totalorder %s27_s13, %s27_s13 }
   0xa   :  { %p881_p3 = scmp.ne.s32.totalorder %s27_s13, %s880_s21  ;;  %p886_p5 = scmp.lt.s32.totalorder %s880_s21, %s880_s21 }
   0xc   :  { %p887_p6 = por %p886_p5, %p885_p4 }
   0xe   :  { %p888_p7 = pnand %p887_p6, %p881_p3 }
  0x10   :  { %891 = shalt.err (!%p888_p7)
}
  0x11   :  { %s965_s22 = smov 128   ;;  %s966_s23 = smov 8  }
  0x12   :  { %32 = dma.hbm_to_vmem [thread:$0]  %s1114_s1, 2048, %s27_s13, [#allocation8], %s965_s22, %s965_s22, %s966_s23  }
  0x13   :  { %s967_s26 = smov [#allocation4]   ;;  %s968_s28 = smov [#allocation9]  }
  0x14   :  { %s17_s27 = sshll.u32 %s967_s26, 4  ;;  %s38_s29 = sshll.u32 %s968_s28, 4  ;;  %s18_s27 = int_to_ptr.vmem [resolvable:$true] %s17_s27  ;;  %s39_s29 = int_to_ptr.vmem [resolvable:$true] %s38_s29 }
  0x15   :  { %s892_s5 = scalar_lea.hbm %s1113_s0, 16 }
  0x16   :  { %p893_p8 = scmp.ne.s32.totalorder %s1113_s0, %s892_s5  ;;  %p896_p9 = scmp.lt.u32.totalorder %s892_s5, %s1113_s0 }
  0x18   :  { %p898_p10 = pnand %p896_p9, %p893_p8 }
  0x1a   :  { %901 = shalt.err (!%p898_p10)
}
  0x1b   :  { %s902_s1 = scalar_lea.vmem %s18_s27, 16  ;;  %s906_s10 = scalar_lea.vmem %s18_s27, 32 }
  0x1c   :  { %p903_p11 = scmp.ne.s32.totalorder %s18_s27, %s902_s1  ;;  %p907_p12 = scmp.lt.s32.totalorder %s18_s27, %s18_s27 }
  0x1d   :  { %p908_p13 = scmp.lt.s32.totalorder %s906_s10, %s902_s1 }
  0x1f   :  { %p909_p0 = por %p908_p13, %p907_p12 }
  0x21   :  { %p910_p1 = pnand %p909_p0, %p903_p11 }
  0x23   :  { %913 = shalt.err (!%p910_p1)
}
  0x24   :  { %20 = dma.hbm_to_vmem [thread:$0]  %s1113_s0, 16, %s18_s27, [#allocation5]  }
  0x25   :  { %s914_s15 = scalar_lea.hbm %s1115_s2, 2048 }
  0x26   :  { %p915_p2 = scmp.ne.s32.totalorder %s1115_s2, %s914_s15  ;;  %p918_p3 = scmp.lt.u32.totalorder %s914_s15, %s1115_s2 }
  0x28   :  { %p920_p4 = pnand %p918_p3, %p915_p2 }
  0x2a   :  { %923 = shalt.err (!%p920_p4)
}
  0x2b   :  { %s924_s20 = scalar_lea.vmem %s39_s29, 2048  ;;  %p929_p6 = scmp.lt.s32.totalorder %s39_s29, %s39_s29 }
  0x2c   :  { %p925_p5 = scmp.ne.s32.totalorder %s39_s29, %s924_s20  ;;  %p930_p7 = scmp.lt.s32.totalorder %s924_s20, %s924_s20 }
  0x2e   :  { %p931_p8 = por %p930_p7, %p929_p6 }
  0x30   :  { %p932_p9 = pnand %p931_p8, %p925_p5 }
  0x32   :  { %935 = shalt.err (!%p932_p9)
}
  0x33   :  { %44 = dma.hbm_to_vmem [thread:$0]  %s1115_s2, 2048, %s39_s29, [#allocation8], %s965_s22, %s965_s22, %s966_s23  }
  0x34   :  { %958 = dma.done.wait [#allocation5], 16  }
  0x35   :  { %959 = vsyncadd [#allocation5], 4294967280 }
  0x36   :  { %960 = dma.done.wait [#allocation8], 4096  }
  0x37   :  { %961 = vsyncadd [#allocation8], 4294963200  ;;  %v94_v0 = vlaneseq  ;;  %v969_v1 = vmov 0.0   ;;  %v62_v4 = vld [vmem:[#allocation7] sm:$0xff]  ;;  %v859_v8 = vld [vmem:[#allocation4] ss:$0 sm:$0xff] }
  0x38   :  { %518 = vadd.xlane.f32.xlu1 %v969_v1  ;;  %v1048_v6 = vadd.f32 0.2, %v62_v4  ;;  %v78_v7 = vld [vmem:[#allocation9] sm:$0xff]  ;;  %vm970_vm5 = vmmov 1   ;;  %v971_v14 = vmov inf   ;;  %v972_v18 = vmov -inf  }
  0x39   :  { %v95_v2 = vshrl.u32 %v94_v0, 7  ;;  %v1037_v3 = vand.u32 127, %v94_v0  ;;  %vm196_vm2 = vcmp.ge.f32.partialorder %v78_v7, 1.0  ;;  %61 = vst [vmem:[#allocation3] sm:$0x1] %v971_v14  ;;  %vm836_vm10 = vcmask 1040384  }
  0x3a   :  { %v721_v9 = vsub.f32 %v1048_v6, %v859_v8  ;;  %60 = vst [vmem:[#allocation2] sm:$0x1] %v972_v18  ;;  %vm58_vm11 = vcmask 8192   ;;  %vm573_vm12 = vcmask 0   ;;  %vm664_vm13 = vcmask 8200   ;;  %s973_s2 = smov [#allocation10]  }
  0x3b   :  { %vm164_vm0 = vcmp.eq.s32.totalorder %v95_v2, %v1037_v3  ;;  %vm147_vm1 = vcmp.lt.s32.totalorder %v1037_v3, 8  ;;  %59 = vst.msk [vmem:[#allocation10] sm:$0x1] %vm58_vm11, %v969_v1  ;;  %s849_s22 = sshll.u32 %s973_s2, 4  ;;  %s850_s22 = int_to_ptr.vmem [resolvable:$true] %s849_s22 }
  0x3c   :  { %520 = vadd.xlane.f32.xlu1 %v969_v1  ;;  %v404_v5 = vsel %vm164_vm0, %v62_v4, -inf  ;;  %vm212_vm3 = vmand %vm196_vm2, %vm147_vm1  ;;  %v737_v10 = vmax.f32 %v721_v9, 0.0  ;;  %s936_s23 = scalar_lea.vmem %s850_s22, 16  ;;  %s940_s24 = scalar_lea.vmem %s850_s22, 32 }
  0x3d   :  { %420 = vmax.xlane.f32.xlu0 %v404_v5  ;;  %vm228_vm4 = vmor %vm164_vm0, %vm212_vm3  ;;  %p937_p10 = scmp.ne.s32.totalorder %s850_s22, %s936_s23  ;;  %p941_p11 = scmp.lt.s32.totalorder %s850_s22, %s850_s22 }
  0x3e   :  { %vm244_vm6 = vmxor %vm147_vm1, %vm970_vm5  ;;  %p942_p12 = scmp.lt.s32.totalorder %s940_s24, %s936_s23 }
  0x3f   :  { %vm1061_vm7 = vmor %vm228_vm4, %vm244_vm6 }
  0x40   :  { %524 = vadd.xlane.f32.xlu1 %v969_v1  ;;  %v753_v12 = vsel %vm1061_vm7, 0.0, %v737_v10  ;;  %vm276_vm8 = vmxor %vm212_vm3, %vm970_vm5  ;;  %v308_v17 = vsel %vm1061_vm7, -inf, %v62_v4  ;;  %v690_v35 = vld [vmem:[#allocation3] sm:$0x1]  ;;  %p943_p13 = por %p942_p12, %p941_p11 }
  0x41   :  { %522 = vadd.xlane.f32.xlu0 %v969_v1  ;;  %vm292_vm9 = vmor %vm276_vm8, %vm164_vm0  ;;  %v682_v19 = vrot.slane %v308_v17, 4  ;;  %v666_v29 = vld [vmem:[#allocation2] sm:$0x1] }
  0x42   :  { %v324_v13 = vsel %vm292_vm9, 1.0, %v62_v4  ;;  %p944_p0 = pnand %p943_p13, %p937_p10 }
  0x43   :  { %v691_v15 = vmin.f32 %v324_v13, 1.0  ;;  %v683_v21 = vmax.f32 %v308_v17, %v682_v19 }
  0x44   :  { %528 = vadd.xlane.f32.xlu1 %v969_v1 }
  0x45   :  { %526 = vadd.xlane.f32.xlu0 %v969_v1  ;;  %v695_v16 = vmin.f32 %v691_v15, 1.0  ;;  %v684_v23 = vrot.slane %v683_v21, 2 }
  0x47   :  { %v699_v20 = vmin.f32 %v695_v16, 1.0  ;;  %v685_v25 = vmax.f32 %v683_v21, %v684_v23 }
  0x48   :  { %532 = vadd.xlane.f32.xlu1 %v969_v1 }
  0x49   :  { %530 = vadd.xlane.f32.xlu0 %v969_v1  ;;  %v703_v22 = vmin.f32 %v699_v20, 1.0  ;;  %v686_v27 = vrot.slane %v685_v25, 1 }
  0x4b   :  { %v705_v24 = vmin.f32 %v703_v22, 1.0  ;;  %v687_v30 = vmax.f32 %v685_v25, %v686_v27 }
  0x4c   :  { %536 = vadd.xlane.f32.xlu1 %v969_v1 }
  0x4d   :  { %534 = vadd.xlane.f32.xlu0 %v969_v1  ;;  %v706_v26 = vrot.slane %v705_v24, 4  ;;  %v688_v32 = vmax.f32 %v666_v29, %v687_v30 }
  0x4f   :  { %v707_v28 = vmin.f32 %v705_v24, %v706_v26  ;;  %689 = vst [vmem:[#allocation2] sm:$0x1] %v688_v32 }
  0x50   :  { %769 = vadd.xlane.f32.xlu1 %v753_v12 }
  0x51   :  { %v708_v31 = vrot.slane %v707_v28, 2 }
  0x53   :  { %v709_v33 = vmin.f32 %v707_v28, %v708_v31 }
  0x54   :  { %540 = vadd.xlane.f32.xlu1 %v969_v1 }
  0x55   :  { %v710_v34 = vrot.slane %v709_v33, 1 }
  0x56   :  { %v829_v38 = vld [vmem:[#allocation2] sm:$0x1] }
  0x57   :  { %v711_v36 = vmin.f32 %v709_v33, %v710_v34 }
  0x58   :  { %542 = vadd.xlane.f32.xlu1 %v969_v1 }
  0x59   :  { %v712_v37 = vmin.f32 %v690_v35, %v711_v36 }
  0x5b   :  { %713 = vst [vmem:[#allocation3] sm:$0x1] %v712_v37 }
  0x5c   :  { %544 = vadd.xlane.f32.xlu1 %v969_v1 }
  0x60   :  { %546 = vadd.xlane.f32.xlu1 %v969_v1 }
  0x62   :  { %v830_v39 = vld [vmem:[#allocation3] sm:$0x1] }
  0x63   :  { %v831_v40 = vsub.f32 0.1, %v830_v39 }
  0x64   :  { %781 = vadd.xlane.f32.xlu1 %v969_v1 }
  0x65   :  { %v832_v41 = vadd.f32 %v831_v40, %v829_v38 }
  0x67   :  { %v833_v42 = vmax.f32 %v832_v41, 0.0 }
  0x68   :  { %372 = vmin.xlane.f32.xlu1 %v324_v13 }
  0x69   :  { %v834_v43 = vsel %vm147_vm1, %v833_v42, 0.0 }
  0x6a   :  { %v837_v44 = vsel %vm836_vm10, %v834_v43, 0.0 }
  0x6c   :  { %340 = vmax.xlane.f32.xlu1 %v308_v17 }
  0x70   :  { %789 = vadd.xlane.f32.xlu1 %v969_v1 }
  0x74   :  { %793 = vadd.xlane.f32.xlu1 %v969_v1 }
  0x78   :  { %797 = vadd.xlane.f32.xlu1 %v969_v1 }
  0x7c   :  { %838 = vadd.xlane.f32.xlu1 %v837_v44 }
  0xc5   :  { %v519_v49 = vpop.xlane.xlu1 %518 }
  0xc9   :  { %v521_v50 = vpop.xlane.xlu1 %520 }
  0xca   :  { %v421_v45 = vpop.xlane.xlu0 %420 }
  0xcb   :  { %v468_v46 = vsub.f32 %v1048_v6, %v421_v45 }
  0xcd   :  { %v484_v47 = vmax.f32 %v468_v46, 0.0  ;;  %v525_v51 = vpop.xlane.xlu1 %524 }
  0xce   :  { %v523_v55 = vpop.xlane.xlu0 %522 }
  0xcf   :  { %v500_v48 = vsel %vm1061_vm7, 0.0, %v484_v47 }
  0xd0   :  { %516 = vadd.xlane.f32.xlu0 %v500_v48 }
  0xd1   :  { %v529_v52 = vpop.xlane.xlu1 %528 }
  0xd2   :  { %v527_v57 = vpop.xlane.xlu0 %526 }
  0xd4   :  { %538 = vadd.xlane.f32.xlu0 %v969_v1 }
  0xd5   :  { %v533_v53 = vpop.xlane.xlu1 %532 }
  0xd6   :  { %v531_v59 = vpop.xlane.xlu0 %530 }
  0xd8   :  { %771 = vadd.xlane.f32.xlu0 %v969_v1 }
  0xd9   :  { %v537_v54 = vpop.xlane.xlu1 %536 }
  0xda   :  { %v535_v61 = vpop.xlane.xlu0 %534 }
  0xdc   :  { %773 = vadd.xlane.f32.xlu0 %v969_v1 }
  0xdd   :  { %v770_v56 = vpop.xlane.xlu1 %769 }
  0xe0   :  { %775 = vadd.xlane.f32.xlu0 %v969_v1 }
  0xe1   :  { %v541_v58 = vpop.xlane.xlu1 %540 }
  0xe4   :  { %777 = vadd.xlane.f32.xlu0 %v969_v1 }
  0xe5   :  { %v543_v60 = vpop.xlane.xlu1 %542 }
  0xe8   :  { %779 = vadd.xlane.f32.xlu0 %v969_v1 }
  0xe9   :  { %v545_v62 = vpop.xlane.xlu1 %544 }
  0xec   :  { %783 = vadd.xlane.f32.xlu0 %v969_v1 }
  0xed   :  { %v547_v0 = vpop.xlane.xlu1 %546 }
  0xf0   :  { %785 = vadd.xlane.f32.xlu0 %v969_v1 }
  0xf1   :  { %v782_v5 = vpop.xlane.xlu1 %781 }
  0xf4   :  { %787 = vadd.xlane.f32.xlu0 %v969_v1 }
  0xf5   :  { %v373_v11 = vpop.xlane.xlu1 %372 }
  0xf6   :  { %v575_v17 = vsub.f32 0.1, %v373_v11 }
  0xf8   :  { %791 = vadd.xlane.f32.xlu0 %v969_v1 }
  0xf9   :  { %v341_v18 = vpop.xlane.xlu1 %340 }
  0xfa   :  { %v591_v24 = vadd.f32 %v575_v17, %v341_v18 }
  0xfc   :  { %795 = vadd.xlane.f32.xlu0 %v969_v1  ;;  %v607_v30 = vmax.f32 %v591_v24, 0.0 }
  0xfd   :  { %v790_v38 = vpop.xlane.xlu1 %789 }
  0xfe   :  { %v655_v34 = vrot.slane %v607_v30, 4 }
 0x100   :  { %799 = vadd.xlane.f32.xlu0 %v969_v1  ;;  %v656_v40 = vadd.f32 %v655_v34, %v607_v30 }
 0x101   :  { %v794_v48 = vpop.xlane.xlu1 %793 }
 0x102   :  { %v657_v46 = vrot.slane %v656_v40, 2 }
 0x15d   :  { %v517_v63 = vpop.xlane.xlu0 %516 }
 0x15e   :  { %v548_v2 = vadd.f32 %v519_v49, %v517_v63 }
 0x160   :  { %v549_v3 = vadd.f32 %v548_v2, %v521_v50 }
 0x161   :  { %v539_v4 = vpop.xlane.xlu0 %538 }
 0x162   :  { %v550_v1 = vadd.f32 %v549_v3, %v523_v55  ;;  %v569_v55 = vld [vmem:[#allocation10] sm:$0x1] }
 0x164   :  { %v551_v6 = vadd.f32 %v550_v1, %v525_v51 }
 0x165   :  { %v772_v7 = vpop.xlane.xlu0 %771 }
 0x166   :  { %v552_v8 = vadd.f32 %v551_v6, %v527_v57  ;;  %v801_v16 = vadd.f32 %v772_v7, %v770_v56 }
 0x168   :  { %v553_v9 = vadd.f32 %v552_v8, %v529_v52 }
 0x169   :  { %v774_v10 = vpop.xlane.xlu0 %773 }
 0x16a   :  { %v554_v12 = vadd.f32 %v553_v9, %v531_v59  ;;  %v802_v20 = vadd.f32 %v801_v16, %v774_v10  ;;  %v798_v59 = vpop.xlane.xlu1 %797 }
 0x16c   :  { %v555_v13 = vadd.f32 %v554_v12, %v533_v53  ;;  %v658_v53 = vadd.f32 %v657_v46, %v656_v40 }
 0x16d   :  { %v776_v14 = vpop.xlane.xlu0 %775 }
 0x16e   :  { %v556_v15 = vadd.f32 %v555_v13, %v535_v61  ;;  %v803_v23 = vadd.f32 %v802_v20, %v776_v14  ;;  %v659_v61 = vrot.slane %v658_v53, 1 }
 0x170   :  { %v557_v19 = vadd.f32 %v556_v15, %v537_v54  ;;  %v660_v2 = vadd.f32 %v659_v61, %v658_v53  ;;  %v839_v15 = vpop.xlane.xlu1 %838 }
 0x171   :  { %v778_v21 = vpop.xlane.xlu0 %777  ;;  %v840_v16 = vmul.f32 0.125, %v839_v15 }
 0x172   :  { %v558_v22 = vadd.f32 %v557_v19, %v539_v4  ;;  %v804_v26 = vadd.f32 %v803_v23, %v778_v21  ;;  %v662_v1 = vmul.f32 0.125, %v660_v2 }
 0x174   :  { %v559_v25 = vadd.f32 %v558_v22, %v541_v58 }
 0x175   :  { %v780_v27 = vpop.xlane.xlu0 %779 }
 0x176   :  { %v560_v28 = vadd.f32 %v559_v25, %v543_v60  ;;  %v805_v29 = vadd.f32 %v804_v26, %v780_v27 }
 0x178   :  { %v561_v31 = vadd.f32 %v560_v28, %v545_v62  ;;  %v806_v35 = vadd.f32 %v805_v29, %v782_v5 }
 0x179   :  { %v784_v32 = vpop.xlane.xlu0 %783 }
 0x17a   :  { %v562_v33 = vadd.f32 %v561_v31, %v547_v0  ;;  %v807_v41 = vadd.f32 %v806_v35, %v784_v32 }
 0x17c   :  { %v563_v36 = vrot.slane %v562_v33, 4 }
 0x17d   :  { %v786_v37 = vpop.xlane.xlu0 %785 }
 0x17e   :  { %v564_v39 = vadd.f32 %v563_v36, %v562_v33  ;;  %v808_v43 = vadd.f32 %v807_v41, %v786_v37 }
 0x180   :  { %v565_v42 = vrot.slane %v564_v39, 2 }
 0x181   :  { %v788_v44 = vpop.xlane.xlu0 %787 }
 0x182   :  { %v566_v45 = vadd.f32 %v565_v42, %v564_v39  ;;  %v809_v47 = vadd.f32 %v808_v43, %v788_v44 }
 0x184   :  { %v567_v49 = vrot.slane %v566_v45, 1  ;;  %v810_v50 = vadd.f32 %v809_v47, %v790_v38 }
 0x185   :  { %v792_v51 = vpop.xlane.xlu0 %791 }
 0x186   :  { %v568_v52 = vadd.f32 %v567_v49, %v566_v45  ;;  %v811_v54 = vadd.f32 %v810_v50, %v792_v51 }
 0x188   :  { %v571_v56 = vmul.f32 0.017857144, %v568_v52  ;;  %v812_v57 = vadd.f32 %v811_v54, %v794_v48 }
 0x189   :  { %v796_v58 = vpop.xlane.xlu0 %795 }
 0x18a   :  { %v572_v60 = vadd.f32 %v571_v56, %v569_v55  ;;  %v813_v62 = vadd.f32 %v812_v57, %v796_v58 }
 0x18c   :  { %574 = vst.msk [vmem:[#allocation10] sm:$0x1] %vm573_vm12, %v572_v60  ;;  %v814_v63 = vadd.f32 %v813_v62, %v798_v59 }
 0x18d   :  { %v800_v0 = vpop.xlane.xlu0 %799 }
 0x18e   :  { %v815_v3 = vadd.f32 %v814_v63, %v800_v0 }
 0x190   :  { %v816_v4 = vrot.slane %v815_v3, 4 }
 0x192   :  { %v817_v5 = vadd.f32 %v816_v4, %v815_v3 }
 0x193   :  { %v639_v6 = vld [vmem:[#allocation10] sm:$0x1] }
 0x194   :  { %v663_v7 = vadd.f32 %v662_v1, %v639_v6  ;;  %v818_v8 = vrot.slane %v817_v5, 2 }
 0x196   :  { %665 = vst.msk [vmem:[#allocation10] sm:$0x1] %vm664_vm13, %v663_v7  ;;  %v819_v9 = vadd.f32 %v818_v8, %v817_v5 }
 0x198   :  { %v820_v10 = vrot.slane %v819_v9, 1 }
 0x19a   :  { %v821_v11 = vadd.f32 %v820_v10, %v819_v9 }
 0x19c   :  { %v823_v12 = vmul.f32 0.017857144, %v821_v11 }
 0x19d   :  { %v822_v13 = vld [vmem:[#allocation10] sm:$0x1] }
 0x19e   :  { %v824_v14 = vadd.f32 %v823_v12, %v822_v13 }
 0x1a0   :  { %825 = vst.msk [vmem:[#allocation10] sm:$0x1] %vm573_vm12, %v824_v14 }
 0x1a7   :  { %v835_v17 = vld [vmem:[#allocation10] sm:$0x1] }
 0x1a8   :  { %v841_v18 = vadd.f32 %v840_v16, %v835_v17 }
 0x1aa   :  { %842 = vst.msk [vmem:[#allocation10] sm:$0x1] %vm664_vm13, %v841_v18 }
 0x1ab   :  { %947 = shalt.err (!%p944_p0)
}
 0x1ac   :  { %s948_s27 = scalar_lea.hbm %s1116_s3, 16 }
 0x1ad   :  { %p949_p1 = scmp.ne.s32.totalorder %s1116_s3, %s948_s27  ;;  %p952_p2 = scmp.lt.u32.totalorder %s948_s27, %s1116_s3 }
 0x1af   :  { %p954_p3 = pnand %p952_p2, %p949_p1 }
 0x1b1   :  { %957 = shalt.err (!%p954_p3)
}
 0x1b2   :  { %852 = dma.vmem_to_hbm [thread:$0]  %s850_s22, 16, %s1116_s3, [#allocation6]  }
 0x1b3   :  { %962 = dma.done.wait [#allocation6], 16  }
 0x1b4   :  { %963 = vsyncadd [#allocation6], 4294967280 }
 0x1b5   :  { %856 = vsyncpa [#allocation5], 1 }
 0x1b6   :  { %857 = vsyncpa [#allocation8], 1 }
 0x1b7   :  { %858 = vsyncpa [#allocation6], 1 }

</bundles_post_ra>
